<compile_context>
chip_gen: v5e
topology: v5e:2x2
jax: 0.10.0
libtpu: 0.0.40
codegen_flags: <defaults>
</compile_context>

<pallas_src>
import jax
import jax.numpy as jnp
from jax.experimental import pallas as pl
from jax.experimental.pallas import tpu as pltpu


def peda_lstm_kernel(xt_ref, w_iog_ref, b_iog_ref, w_lin_ref, b_lin_ref, o_ref):
    H = w_lin_ref.shape[0]  # hidden size (static)

    xt = xt_ref[...].astype(jnp.float32)          # (D, TB), batch on lanes

    # gates^T = W_iog @ x^T + (b_ih + b_hh)[iog]; rows ordered [i | o | g].
    gates = (
        jnp.dot(w_iog_ref[...], xt, preferred_element_type=jnp.float32)
        + b_iog_ref[...]
    )                                              # (3H, TB)

    # One contiguous EUP sigmoid pass over the i/o rows, one tanh over g rows.
    sig = jax.nn.sigmoid(gates[: 2 * H, :])
    i_g = sig[:H, :]
    o_g = sig[H:, :]
    g_g = jnp.tanh(gates[2 * H :, :])

    c = i_g * g_g                                  # f_gate * c0 == 0, dropped
    h = o_g * jnp.tanh(c)                          # (H, TB)

    # N=1 linear head: VPU multiply + sublane reduction -> lane-dense (1, TB).
    y = jnp.sum(h * w_lin_ref[...], axis=0, keepdims=True) + b_lin_ref[0]
    o_ref[...] = y.astype(o_ref.dtype)


def peda_lstm_forward(x, params):
    """x: (B, input_size) float32 -> (B,) float32"""
    B, D = x.shape
    H = params["w_lin"].shape[1]

    # --- wrapper-side weight prep (PyTorch gate order is [i, f, g, o]) ---
    w_ih = params["w_ih"]                                     # (4H, D)
    w_iog = jnp.concatenate(
        [w_ih[0 * H:1 * H], w_ih[3 * H:4 * H], w_ih[2 * H:3 * H]], axis=0
    )                                                         # (3H, D), rows = [i|o|g]
    b_full = params["b_ih"] + params["b_hh"]                  # (4H,)
    b_iog = jnp.concatenate(
        [b_full[0 * H:1 * H], b_full[3 * H:4 * H], b_full[2 * H:3 * H]]
    ).reshape(3 * H, 1)                                       # (3H, 1), lane-broadcast
    w_lin_col = params["w_lin"].reshape(H, 1)                 # (H, 1), lane-broadcast
    b_lin = params["b_lin"]                                   # (1,) scalar -> SMEM

    x_t = x.T                                                 # (D, B), batch on lanes

    # Batch tile along lanes. Whole batch if small; otherwise a 512-wide,
    # 128-aligned chunk (comfortably within v7x's 64 MiB VMEM with headroom).
    TB = B if B <= 512 else 512
    grid = (pl.cdiv(B, TB),)

    out = pl.pallas_call(
        peda_lstm_kernel,
        out_shape=jax.ShapeDtypeStruct((1, B), jnp.float32),
        grid=grid,
        in_specs=[
            pl.BlockSpec((D, TB), lambda i: (0, i)),          # x^T: tiled over batch
            pl.BlockSpec((3 * H, D), lambda i: (0, 0)),       # gate weights: resident
            pl.BlockSpec((3 * H, 1), lambda i: (0, 0)),       # combined gate bias
            pl.BlockSpec((H, 1), lambda i: (0, 0)),           # linear column
            pl.BlockSpec(memory_space=pltpu.SMEM),            # b_lin scalar
        ],
        out_specs=pl.BlockSpec((1, TB), lambda i: (0, i)),    # lane-dense output slab
        compiler_params=pltpu.CompilerParams(
            dimension_semantics=("parallel",),
            vmem_limit_bytes=32 << 20,
        ),
    )(x_t, w_iog, b_iog, w_lin_col, b_lin)

    return out[0]  # (B,)


def init_params(key, input_size, hidden_size):
    """Deterministic parameter init matching nn.LSTM / nn.Linear shapes."""
    k = jax.random.split(key, 6)
    s = 1.0 / jnp.sqrt(hidden_size)
    return {
        "w_ih": jax.random.uniform(k[0], (4 * hidden_size, input_size), jnp.float32, -s, s),
        "w_hh": jax.random.uniform(k[1], (4 * hidden_size, hidden_size), jnp.float32, -s, s),
        "b_ih": jax.random.uniform(k[2], (4 * hidden_size,), jnp.float32, -s, s),
        "b_hh": jax.random.uniform(k[3], (4 * hidden_size,), jnp.float32, -s, s),
        "w_lin": jax.random.uniform(k[4], (1, hidden_size), jnp.float32, -s, s),
        "b_lin": jax.random.uniform(k[5], (1,), jnp.float32, -s, s),
    }


def reference_forward(x, params):
    """Pure-JAX reference reproducing the PyTorch forward (full gate math, zero state)."""
    H = params["w_hh"].shape[1]
    gates = x @ params["w_ih"].T + params["b_ih"] + params["b_hh"]
    i = jax.nn.sigmoid(gates[:, 0 * H:1 * H])
    f = jax.nn.sigmoid(gates[:, 1 * H:2 * H])
    g = jnp.tanh(gates[:, 2 * H:3 * H])
    o = jax.nn.sigmoid(gates[:, 3 * H:4 * H])
    c = f * 0.0 + i * g
    h = o * jnp.tanh(c)
    return (h @ params["w_lin"].T + params["b_lin"])[:, 0]


if __name__ == "__main__":
    input_size = 16
    hidden_size = 64
    batch = 8

    key = jax.random.PRNGKey(0)
    kx, kp = jax.random.split(key)
    x = jax.random.normal(kx, (batch, input_size), jnp.float32)
    params = init_params(kp, input_size, hidden_size)

    y = peda_lstm_forward(x, params)
    y = jax.block_until_ready(y)

    y_ref = reference_forward(x, params)
    assert y.shape == (batch,)
    assert jnp.allclose(y, y_ref, atol=1e-5, rtol=1e-5), (y, y_ref)

    print("KERNEL_OK")
</pallas_src>

<mosaic_0001>
module attributes {stable_mosaic.version = 11 : i64} {
  func.func @peda_lstm_kernel(%arg0: i32, %arg1: memref<16x8xf32, #tpu.memory_space<vmem>>, %arg2: memref<192x16xf32, #tpu.memory_space<vmem>>, %arg3: memref<192x1xf32, #tpu.memory_space<vmem>>, %arg4: memref<64x1xf32, #tpu.memory_space<vmem>>, %arg5: memref<1xf32, #tpu.memory_space<smem>>, %arg6: memref<1x8xf32, #tpu.memory_space<vmem>>) attributes {dimension_semantics = [#tpu.dimension_semantics<parallel>], iteration_bounds = array<i64: 1>, scalar_prefetch = 0 : i64, scratch_operands = 0 : i64, tpu.core_type = #tpu.core_type<tc>, window_params = [{transform_indices = @transform_0, window_bounds = array<i64: 16, 8>}, {pipeline_mode = #tpu.pipeline_mode<synchronous>, transform_indices = @transform_1, window_bounds = array<i64: 192, 16>}, {pipeline_mode = #tpu.pipeline_mode<synchronous>, transform_indices = @transform_2, window_bounds = array<i64: 192, 1>}, {pipeline_mode = #tpu.pipeline_mode<synchronous>, transform_indices = @transform_3, window_bounds = array<i64: 64, 1>}, {transform_indices = @transform_4, window_bounds = array<i64: 1>}, {transform_indices = @transform_5, window_bounds = array<i64: 1, 8>}]} {
    %c0 = arith.constant 0 : index
    %c0_0 = arith.constant 0 : index
    %0 = vector.load %arg1[%c0, %c0_0] : memref<16x8xf32, #tpu.memory_space<vmem>>, vector<16x8xf32>
    %c0_1 = arith.constant 0 : index
    %c0_2 = arith.constant 0 : index
    %1 = vector.load %arg2[%c0_1, %c0_2] : memref<192x16xf32, #tpu.memory_space<vmem>>, vector<192x16xf32>
    %cst = arith.constant dense<0.000000e+00> : vector<192x8xf32>
    %2 = tpu.matmul %1, %0, %cst {dimension_numbers = #tpu.dot_dimension_numbers<[1], [0], [0], [1], [0, 0, 1, 1], [], []>} : vector<192x16xf32>, vector<16x8xf32>, vector<192x8xf32> -> vector<192x8xf32>
    %c0_3 = arith.constant 0 : index
    %c0_4 = arith.constant 0 : index
    %3 = vector.load %arg3[%c0_3, %c0_4] : memref<192x1xf32, #tpu.memory_space<vmem>>, vector<192x1xf32>
    %4 = vector.broadcast %3 : vector<192x1xf32> to vector<192x8xf32>
    %5 = arith.addf %2, %4 : vector<192x8xf32>
    %6 = vector.extract_strided_slice %5 {offsets = [0, 0], sizes = [128, 8], strides = [1, 1]} : vector<192x8xf32> to vector<128x8xf32>
    %7 = arith.negf %6 : vector<128x8xf32>
    %8 = math.exp %7 : vector<128x8xf32>
    %cst_5 = arith.constant 1.000000e+00 : f32
    %9 = vector.broadcast %cst_5 : f32 to vector<128x8xf32>
    %10 = arith.addf %9, %8 : vector<128x8xf32>
    %11 = arith.divf %9, %10 : vector<128x8xf32>
    %12 = vector.extract_strided_slice %11 {offsets = [0, 0], sizes = [64, 8], strides = [1, 1]} : vector<128x8xf32> to vector<64x8xf32>
    %13 = vector.extract_strided_slice %11 {offsets = [64, 0], sizes = [64, 8], strides = [1, 1]} : vector<128x8xf32> to vector<64x8xf32>
    %14 = vector.extract_strided_slice %5 {offsets = [128, 0], sizes = [64, 8], strides = [1, 1]} : vector<192x8xf32> to vector<64x8xf32>
    %15 = math.tanh %14 : vector<64x8xf32>
    %16 = arith.mulf %12, %15 : vector<64x8xf32>
    %17 = math.tanh %16 : vector<64x8xf32>
    %18 = arith.mulf %13, %17 : vector<64x8xf32>
    %c0_6 = arith.constant 0 : index
    %c0_7 = arith.constant 0 : index
    %19 = vector.load %arg4[%c0_6, %c0_7] : memref<64x1xf32, #tpu.memory_space<vmem>>, vector<64x1xf32>
    %20 = vector.broadcast %19 : vector<64x1xf32> to vector<64x8xf32>
    %21 = arith.mulf %18, %20 : vector<64x8xf32>
    %cst_8 = arith.constant dense<0.000000e+00> : vector<8xf32>
    %22 = vector.multi_reduction <add>, %21, %cst_8 [0] : vector<64x8xf32> to vector<8xf32>
    %23 = vector.shape_cast %22 : vector<8xf32> to vector<1x8xf32>
    %c0_9 = arith.constant 0 : index
    %24 = memref.load %arg5[%c0_9] : memref<1xf32, #tpu.memory_space<smem>>
    %25 = vector.broadcast %24 : f32 to vector<1x8xf32>
    %26 = arith.addf %23, %25 : vector<1x8xf32>
    %c0_10 = arith.constant 0 : index
    %c0_11 = arith.constant 0 : index
    %27 = vector.load %arg6[%c0_10, %c0_11] : memref<1x8xf32, #tpu.memory_space<vmem>>, vector<1x8xf32>
    tpu.vector_store %arg6[%c0_10, %c0_11], %26 {strides = array<i32>} : memref<1x8xf32, #tpu.memory_space<vmem>>, vector<1x8xf32>,
    return
  }
  func.func @transform_0(%arg0: i32) -> (i32, i32) {
    %c0_i32 = arith.constant 0 : i32
    %c0_i32_0 = arith.constant 0 : i32
    return %c0_i32, %arg0 : i32, i32
  }
  func.func @transform_1(%arg0: i32) -> (i32, i32) {
    %c0_i32 = arith.constant 0 : i32
    %c0_i32_0 = arith.constant 0 : i32
    %c0_i32_1 = arith.constant 0 : i32
    return %c0_i32, %c0_i32_0 : i32, i32
  }
  func.func @transform_2(%arg0: i32) -> (i32, i32) {
    %c0_i32 = arith.constant 0 : i32
    %c0_i32_0 = arith.constant 0 : i32
    %c0_i32_1 = arith.constant 0 : i32
    return %c0_i32, %c0_i32_0 : i32, i32
  }
  func.func @transform_3(%arg0: i32) -> (i32, i32) {
    %c0_i32 = arith.constant 0 : i32
    %c0_i32_0 = arith.constant 0 : i32
    %c0_i32_1 = arith.constant 0 : i32
    return %c0_i32, %c0_i32_0 : i32, i32
  }
  func.func @transform_4(%arg0: i32) -> i32 {
    %c0_i32 = arith.constant 0 : i32
    %c0_i32_0 = arith.constant 0 : i32
    return %c0_i32 : i32
  }
  func.func @transform_5(%arg0: i32) -> (i32, i32) {
    %c0_i32 = arith.constant 0 : i32
    %c0_i32_0 = arith.constant 0 : i32
    return %c0_i32, %arg0 : i32, i32
  }
}

</mosaic_0001>

<bundles_post_ra>
// kernel: tpu_custom_call.1
= control target key start
LH: loop header
LB: loop body
LE: loop exit
PB: predicated region body
PF: predicated region fallthrough
CT: control target
= control target key end

     0   :  { %v962_v1 = vmov 0   ;;  %vm192_vm0 = vcmask 130048   ;;  %s1654_s0 = inlined_call_operand.vmem [shape: f32[16,8], index: 0, kind: input, shape index: {}]   ;;  %s1655_s1 = inlined_call_operand.vmem [shape: f32[192,16], index: 1, kind: input, shape index: {}]   ;;  %s1656_s2 = inlined_call_operand.vmem [shape: f32[192,1], index: 2, kind: input, shape index: {}]   ;;  %s1657_s3 = inlined_call_operand.vmem [shape: f32[64,1], index: 3, kind: input, shape index: {}]   ;;  %s1658_s4 = inlined_call_operand.<no memory space> [shape: f32[1], index: 4, kind: input, shape index: {}]   ;;  %s1659_s5 = inlined_call_operand.hbm [shape: f32[1,8], index: 5, kind: output, shape index: {}]  }
   0x1   :  { %v23_v0 = vld [vmem:[%s1654_s0 + $0x8] sm:$0xff]  ;;  %839 = vset.pattern.permute.xlu2 %v962_v1  ;;  %838 = vset.pattern.permute.xlu1 %v962_v1  ;;  %v52_v2 = vld [vmem:[%s1656_s2 + $0x20] sm:$0xff]  ;;  %v50_v3 = vld [vmem:[%s1656_s2 + $0x10] sm:$0xff] }
   0x2   :  { %837 = vset.pattern.permute.xlu0 %v962_v1  ;;  %279 = vmatpush.msra.mxu0 %v23_v0  ;;  %v48_v4 = vld [vmem:[%s1656_s2] sm:$0xff]  ;;  %v30_v7 = vld [vmem:[%s1655_s1 + $0x30] sm:$0xff]  ;;  %v53_v10 = vld [vmem:[%s1656_s2 + $0x28] sm:$0xff] }
   0x3   :  { %829 = vmatpush.msra.mxu1 %v23_v0  ;;  %830 = vmatpush.msra.mxu2 %v23_v0  ;;  %v22_v5 = vld [vmem:[%s1654_s0] sm:$0xff]  ;;  %v42_v9 = vld [vmem:[%s1655_s1 + $0x90] sm:$0xff]  ;;  %v51_v11 = vld [vmem:[%s1656_s2 + $0x18] sm:$0xff] }
   0x4   :  { %831 = vmatpush.msra.mxu3 %v23_v0  ;;  %94 = vperm.xlu2 %839, %v52_v2   ;;  %v24_v6 = vld [vmem:[%s1655_s1] sm:$0xff]  ;;  %v49_v12 = vld [vmem:[%s1656_s2 + $0x8] sm:$0xff]  ;;  %v31_v14 = vld [vmem:[%s1655_s1 + $0x38] sm:$0xff] }
   0x5   :  { %84 = vperm.xlu1 %838, %v50_v3   ;;  %74 = vperm.xlu0 %837, %v48_v4   ;;  %v36_v8 = vld [vmem:[%s1655_s1 + $0x60] sm:$0xff]  ;;  %v25_v13 = vld [vmem:[%s1655_s1 + $0x8] sm:$0xff] }
   0x6   :  { %280 = vmatpush.msra.mxu0 %v22_v5  ;;  %832 = vmatpush.msra.mxu1 %v22_v5 }
   0x7   :  { %833 = vmatpush.msra.mxu2 %v22_v5  ;;  %834 = vmatpush.msra.mxu3 %v22_v5 }
   0x8   :  { %789 = vmatmul.msk.f32.vlgmr.msra.gmra.mxu0 %vm192_vm0, %v24_v6  ;;  %795 = vmatmul.msk.f32.vlgmr.msra.gmra.mxu1 %vm192_vm0, %v30_v7 }
   0x9   :  { %801 = vmatmul.msk.f32.vlgmr.msra.gmra.mxu2 %vm192_vm0, %v36_v8  ;;  %807 = vmatmul.msk.f32.vlgmr.msra.gmra.mxu3 %vm192_vm0, %v42_v9 }
   0xc   :  { %99 = vperm.xlu2 %839, %v53_v10  }
   0xd   :  { %89 = vperm.xlu1 %838, %v51_v11   ;;  %79 = vperm.xlu0 %837, %v49_v12  }
   0xe   :  { %11 = vsyncpa [#allocation4], 0  ;;  %v37_v15 = vld [vmem:[%s1655_s1 + $0x68] sm:$0xff]  ;;  %v43_v16 = vld [vmem:[%s1655_s1 + $0x98] sm:$0xff]  ;;  %s963_s29 = smov [#allocation3]   ;;  %s780_s8 = sshll.u32 %s1659_s5, 4  ;;  %s781_s8 = int_to_ptr.hbm [resolvable:$true] %s780_s8 }
   0xf   :  { %v56_v17 = vld [vmem:[%s1656_s2 + $0x40] sm:$0xff]  ;;  %v55_v18 = vld [vmem:[%s1656_s2 + $0x38] sm:$0xff]  ;;  %v54_v19 = vld [vmem:[%s1656_s2 + $0x30] sm:$0xff]  ;;  %s778_s30 = sshll.u32 %s963_s29, 4  ;;  %s779_s30 = int_to_ptr.vmem [resolvable:$true] %s778_s30 }
  0x10   :  { %790 = vmatmul.msk.f32.gmra.mxu0 %vm192_vm0, %v25_v13  ;;  %796 = vmatmul.msk.f32.gmra.mxu1 %vm192_vm0, %v31_v14  ;;  %v26_v20 = vld [vmem:[%s1655_s1 + $0x10] sm:$0xff]  ;;  %v32_v21 = vld [vmem:[%s1655_s1 + $0x40] sm:$0xff]  ;;  %v59_v24 = vld [vmem:[%s1656_s2 + $0x58] sm:$0xff] }
  0x11   :  { %802 = vmatmul.msk.f32.gmra.mxu2 %vm192_vm0, %v37_v15  ;;  %808 = vmatmul.msk.f32.gmra.mxu3 %vm192_vm0, %v43_v16  ;;  %v38_v22 = vld [vmem:[%s1655_s1 + $0x70] sm:$0xff]  ;;  %v44_v23 = vld [vmem:[%s1655_s1 + $0xa0] sm:$0xff]  ;;  %v57_v26 = vld [vmem:[%s1656_s2 + $0x48] sm:$0xff] }
  0x12   :  { %v58_v25 = vld [vmem:[%s1656_s2 + $0x50] sm:$0xff]  ;;  %v27_v27 = vld [vmem:[%s1655_s1 + $0x18] sm:$0xff]  ;;  %v33_v28 = vld [vmem:[%s1655_s1 + $0x48] sm:$0xff] }
  0x13   :  { %v39_v29 = vld [vmem:[%s1655_s1 + $0x78] sm:$0xff]  ;;  %v45_v30 = vld [vmem:[%s1655_s1 + $0xa8] sm:$0xff]  ;;  %v62_v31 = vld [vmem:[%s1656_s2 + $0x70] sm:$0xff] }
  0x14   :  { %114 = vperm.xlu2 %839, %v56_v17   ;;  %v61_v32 = vld [vmem:[%s1656_s2 + $0x68] sm:$0xff]  ;;  %v60_v33 = vld [vmem:[%s1656_s2 + $0x60] sm:$0xff]  ;;  %v34_v35 = vld [vmem:[%s1655_s1 + $0x50] sm:$0xff] }
  0x15   :  { %109 = vperm.xlu1 %838, %v55_v18   ;;  %104 = vperm.xlu0 %837, %v54_v19   ;;  %v28_v34 = vld [vmem:[%s1655_s1 + $0x20] sm:$0xff]  ;;  %v46_v37 = vld [vmem:[%s1655_s1 + $0xb0] sm:$0xff]  ;;  %v65_v38 = vld [vmem:[%s1656_s2 + $0x88] sm:$0xff] }
  0x16   :  { %v40_v36 = vld [vmem:[%s1655_s1 + $0x80] sm:$0xff]  ;;  %v63_v40 = vld [vmem:[%s1656_s2 + $0x78] sm:$0xff]  ;;  %v29_v41 = vld [vmem:[%s1655_s1 + $0x28] sm:$0xff] }
  0x17   :  { %v64_v39 = vld [vmem:[%s1656_s2 + $0x80] sm:$0xff]  ;;  %v35_v42 = vld [vmem:[%s1655_s1 + $0x58] sm:$0xff]  ;;  %v41_v43 = vld [vmem:[%s1655_s1 + $0x88] sm:$0xff] }
  0x18   :  { %791 = vmatmul.msk.f32.gmra.mxu0 %vm192_vm0, %v26_v20  ;;  %797 = vmatmul.msk.f32.gmra.mxu1 %vm192_vm0, %v32_v21  ;;  %v47_v44 = vld [vmem:[%s1655_s1 + $0xb8] sm:$0xff]  ;;  %v68_v45 = vld [vmem:[%s1656_s2 + $0xa0] sm:$0xff]  ;;  %v66_v47 = vld [vmem:[%s1656_s2 + $0x90] sm:$0xff] }
  0x19   :  { %803 = vmatmul.msk.f32.gmra.mxu2 %vm192_vm0, %v38_v22  ;;  %809 = vmatmul.msk.f32.gmra.mxu3 %vm192_vm0, %v44_v23  ;;  %v67_v46 = vld [vmem:[%s1656_s2 + $0x98] sm:$0xff]  ;;  %v70_v49 = vld [vmem:[%s1656_s2 + $0xb0] sm:$0xff]  ;;  %v69_v50 = vld [vmem:[%s1656_s2 + $0xa8] sm:$0xff] }
  0x1a   :  { %v71_v48 = vld [vmem:[%s1656_s2 + $0xb8] sm:$0xff]  ;;  %v692_v51 = vld [vmem:[%s1657_s3 + $0x10] sm:$0xff]  ;;  %v691_v52 = vld [vmem:[%s1657_s3 + $0x8] sm:$0xff] }
  0x1b   :  { %v690_v53 = vld [vmem:[%s1657_s3] sm:$0xff]  ;;  %v695_v54 = vld [vmem:[%s1657_s3 + $0x28] sm:$0xff]  ;;  %v693_v56 = vld [vmem:[%s1657_s3 + $0x18] sm:$0xff] }
  0x1c   :  { %129 = vperm.xlu2 %839, %v59_v24   ;;  %v694_v55 = vld [vmem:[%s1657_s3 + $0x20] sm:$0xff]  ;;  %v697_v57 = vld [vmem:[%s1657_s3 + $0x38] sm:$0xff]  ;;  %v696_v58 = vld [vmem:[%s1657_s3 + $0x30] sm:$0xff] }
  0x1d   :  { %124 = vperm.xlu1 %838, %v58_v25   ;;  %119 = vperm.xlu0 %837, %v57_v26  }
  0x20   :  { %792 = vmatmul.msk.f32.gmra.mxu0 %vm192_vm0, %v27_v27  ;;  %798 = vmatmul.msk.f32.gmra.mxu1 %vm192_vm0, %v33_v28 }
  0x21   :  { %804 = vmatmul.msk.f32.gmra.mxu2 %vm192_vm0, %v39_v29  ;;  %810 = vmatmul.msk.f32.gmra.mxu3 %vm192_vm0, %v45_v30 }
  0x24   :  { %144 = vperm.xlu2 %839, %v62_v31  }
  0x25   :  { %139 = vperm.xlu1 %838, %v61_v32   ;;  %134 = vperm.xlu0 %837, %v60_v33  }
  0x28   :  { %793 = vmatmul.msk.f32.gmra.mxu0 %vm192_vm0, %v28_v34  ;;  %799 = vmatmul.msk.f32.gmra.mxu1 %vm192_vm0, %v34_v35 }
  0x29   :  { %805 = vmatmul.msk.f32.gmra.mxu2 %vm192_vm0, %v40_v36  ;;  %811 = vmatmul.msk.f32.gmra.mxu3 %vm192_vm0, %v46_v37 }
  0x2c   :  { %159 = vperm.xlu2 %839, %v65_v38  }
  0x2d   :  { %154 = vperm.xlu1 %838, %v64_v39   ;;  %149 = vperm.xlu0 %837, %v63_v40  }
  0x30   :  { %794 = vmatmul.msk.f32.gmra.mxu0 %vm192_vm0, %v29_v41  ;;  %800 = vmatmul.msk.f32.gmra.mxu1 %vm192_vm0, %v35_v42 }
  0x31   :  { %806 = vmatmul.msk.f32.gmra.mxu2 %vm192_vm0, %v41_v43  ;;  %812 = vmatmul.msk.f32.gmra.mxu3 %vm192_vm0, %v47_v44 }
  0x34   :  { %174 = vperm.xlu2 %839, %v68_v45  }
  0x35   :  { %169 = vperm.xlu1 %838, %v67_v46   ;;  %164 = vperm.xlu0 %837, %v66_v47  }
  0x3c   :  { %189 = vperm.xlu2 %839, %v71_v48  }
  0x3d   :  { %184 = vperm.xlu1 %838, %v70_v49   ;;  %179 = vperm.xlu0 %837, %v69_v50  }
  0x44   :  { %710 = vperm.xlu2 %839, %v692_v51  }
  0x45   :  { %705 = vperm.xlu1 %838, %v691_v52   ;;  %700 = vperm.xlu0 %837, %v690_v53  }
  0x4c   :  { %725 = vperm.xlu2 %839, %v695_v54  }
  0x4d   :  { %720 = vperm.xlu1 %838, %v694_v55   ;;  %715 = vperm.xlu0 %837, %v693_v56  }
  0x55   :  { %735 = vperm.xlu1 %838, %v697_v57   ;;  %730 = vperm.xlu0 %837, %v696_v58  }
  0x5e   :  { %v1192_v59 = vpop.permute.xlu2 %94 }
  0x66   :  { %v1194_v60 = vpop.permute.xlu2 %99 }
  0x6e   :  { %v115_v61 = vpop.permute.xlu2 %114 }
  0x76   :  { %v1198_v2 = vpop.permute.xlu2 %129 }
  0x77   :  { %v85_v62 = vpop.permute.xlu1 %84  ;;  %v75_v63 = vpop.permute.xlu0 %74 }
  0x7e   :  { %v145_v11 = vpop.permute.xlu2 %144 }
  0x7f   :  { %v1196_v0 = vpop.permute.xlu1 %89  ;;  %v80_v1 = vpop.permute.xlu0 %79 }
  0x85   :  { %v282_v3 = vpop.f32.mrf.mxu0  ;;  %v300_v4 = vpop.f32.mrf.mxu1 }
  0x86   :  { %v283_v5 = vadd.f32 %v282_v3, %v75_v63  ;;  %v1212_v30 = vpop.permute.xlu2 %159 }
  0x87   :  { %v110_v6 = vpop.permute.xlu1 %109  ;;  %v105_v7 = vpop.permute.xlu0 %104 }
  0x88   :  { %v813_v8 = vmul.f32 -1.442695, %v283_v5  ;;  %v301_v9 = vadd.f32 %v300_v4, %v105_v7 }
  0x8a   :  { %840 = vpow2.f32 %v813_v8  ;;  %v819_v10 = vmul.f32 -1.442695, %v301_v9 }
  0x8c   :  { %842 = vpow2.f32 %v819_v10  ;;  %v318_v12 = vpop.f32.mrf.mxu2  ;;  %v1200_v13 = vpop.f32.mrf.mxu3 }
  0x8d   :  { %v285_v14 = vpop.f32.mrf.mxu0  ;;  %v303_v15 = vpop.f32.mrf.mxu1 }
  0x8e   :  { %v286_v16 = vadd.f32 %v285_v14, %v80_v1  ;;  %v304_v17 = vadd.f32 %v303_v15, %v110_v6  ;;  %v175_v4 = vpop.permute.xlu2 %174 }
  0x8f   :  { %v1202_v18 = vpop.permute.xlu1 %124  ;;  %v120_v19 = vpop.permute.xlu0 %119 }
  0x90   :  { %v841_v20 = vpop.eup %840  ;;  %v814_v21 = vmul.f32 -1.442695, %v286_v16  ;;  %v820_v22 = vmul.f32 -1.442695, %v304_v17 }
  0x91   :  { %v1204_v23 = vadd.f32 1.0, %v841_v20 }
  0x92   :  { %v843_v24 = vpop.eup %842  ;;  %844 = vpow2.f32 %v814_v21 }
  0x93   :  { %846 = vrcp.f32 %v1204_v23  ;;  %v1207_v25 = vadd.f32 1.0, %v843_v24  ;;  %vm423_vm2 = vweird.f32 %v1204_v23 }
  0x94   :  { %848 = vpow2.f32 %v820_v22  ;;  %v321_v26 = vpop.f32.mrf.mxu2  ;;  %v1209_v27 = vpop.f32.mrf.mxu3 }
  0x95   :  { %850 = vrcp.f32 %v1207_v25  ;;  %v288_v28 = vpop.f32.mrf.mxu0  ;;  %v306_v29 = vpop.f32.mrf.mxu1  ;;  %v519_v63 = vand.u32 2147483648, %v1207_v25  ;;  %v517_v14 = vand.u32 2147483647, %v1207_v25  ;;  %vm513_vm5 = vweird.f32 %v1207_v25 }
  0x96   :  { %v289_v31 = vadd.f32 %v288_v28, %v85_v62  ;;  %v307_v32 = vadd.f32 %v306_v29, %v115_v61  ;;  %v429_v62 = vand.u32 2147483648, %v1204_v23 }
  0x97   :  { %v140_v33 = vpop.permute.xlu1 %139  ;;  %v135_v34 = vpop.permute.xlu0 %134  ;;  %v1246_v20 = vor.u32 1.1754944e-38, %v519_v63  ;;  %vm1331_vm11 = vcmp.eq.f32.partialorder %v517_v14, 8.507059e+37 }
  0x98   :  { %v845_v35 = vpop.eup %844  ;;  %v815_v36 = vmul.f32 -1.442695, %v289_v31  ;;  %v821_v37 = vmul.f32 -1.442695, %v307_v32  ;;  %v322_v38 = vadd.f32 %v321_v26, %v140_v33  ;;  %v319_v39 = vadd.f32 %v318_v12, %v135_v34 }
  0x99   :  { %v1214_v40 = vpop.eup %846  ;;  %v1216_v41 = vadd.f32 1.0, %v845_v35  ;;  %v427_v12 = vand.u32 2147483647, %v1204_v23  ;;  %v1243_v17 = vor.u32 1.1754944e-38, %v429_v62 }
  0x9a   :  { %v849_v42 = vpop.eup %848  ;;  %v419_v43 = vmul.f32 %v1214_v40, %v1204_v23  ;;  %852 = vpow2.f32 %v815_v36  ;;  %v826_v44 = vmul.f32 -1.442695, %v322_v38  ;;  %v825_v46 = vmul.f32 -1.442695, %v319_v39 }
  0x9b   :  { %v1220_v45 = vpop.eup %850  ;;  %v1224_v48 = vadd.f32 1.0, %v849_v42  ;;  %854 = vpow2.f32 %v821_v37  ;;  %v442_v29 = vand.u32 2147483647, %v1216_v41  ;;  %vm424_vm1 = vweird.f32 %v1214_v40 }
  0x9c   :  { %v509_v47 = vmul.f32 %v1220_v45, %v1207_v25  ;;  %v324_v49 = vpop.f32.mrf.mxu2  ;;  %v342_v50 = vpop.f32.mrf.mxu3  ;;  %856 = vrcp.f32 %v1216_v41  ;;  %v420_v54 = vsub.f32 1.0, %v419_v43  ;;  %vm514_vm3 = vweird.f32 %v1220_v45  ;;  %vm1342_vm12 = vmor %vm423_vm2, %vm424_vm1 }
  0x9d   :  { %v325_v51 = vadd.f32 %v324_v49, %v145_v11  ;;  %v291_v52 = vpop.f32.mrf.mxu0  ;;  %v309_v53 = vpop.f32.mrf.mxu1  ;;  %858 = vpow2.f32 %v826_v44  ;;  %vm1316_vm8 = vcmp.eq.f32.partialorder %v427_v12, 8.507059e+37  ;;  %vm438_vm13 = vweird.f32 %v1216_v41  ;;  %vm1374_vm15 = vmor %vm513_vm5, %vm514_vm3 }
  0x9e   :  { %v292_v55 = vadd.f32 %v291_v52, %v1196_v0  ;;  %v310_v56 = vadd.f32 %v309_v53, %v120_v19  ;;  %860 = vpow2.f32 %v825_v46  ;;  %v510_v3 = vsub.f32 1.0, %v509_v47 }
  0x9f   :  { %v827_v57 = vmul.f32 -1.442695, %v325_v51  ;;  %v1228_v58 = vpop.permute.xlu1 %154  ;;  %v150_v61 = vpop.permute.xlu0 %149  ;;  %862 = vrcp.f32 %v1224_v48  ;;  %v343_v0 = vadd.f32 %v342_v50, %v175_v4  ;;  %v421_v9 = vmul.f32 %v1214_v40, %v420_v54 }
  0xa0   :  { %v853_v1 = vpop.eup %852  ;;  %v816_v5 = vmul.f32 -1.442695, %v292_v55  ;;  %v822_v6 = vmul.f32 -1.442695, %v310_v56  ;;  %v511_v19 = vmul.f32 %v1220_v45, %v510_v3  ;;  %vm1394_vm1 = vcmp.eq.f32.partialorder %v442_v29, 8.507059e+37 }
  0xa1   :  { %v1233_v7 = vadd.f32 1.0, %v853_v1  ;;  %864 = vpow2.f32 %v827_v57  ;;  %v855_v8 = vpop.eup %854  ;;  %v1258_v35 = vadd.f32 %v1214_v40, %v421_v9 }
  0xa2   :  { %866 = vpow2.f32 %v816_v5  ;;  %v1236_v10 = vpop.eup %856  ;;  %v1239_v11 = vadd.f32 1.0, %v855_v8  ;;  %v1273_v46 = vadd.f32 %v1220_v45, %v511_v19 }
  0xa3   :  { %868 = vrcp.f32 %v1233_v7  ;;  %v859_v15 = vpop.eup %858  ;;  %v1263_v37 = vmul.f32 %v1236_v10, %v1216_v41  ;;  %v457_v44 = vand.u32 2147483647, %v1233_v7  ;;  %vm453_vm4 = vweird.f32 %v1233_v7 }
  0xa4   :  { %870 = vpow2.f32 %v822_v6  ;;  %v327_v16 = vpop.f32.mrf.mxu2  ;;  %v861_v21 = vpop.eup %860  ;;  %v1248_v22 = vadd.f32 1.0, %v859_v15  ;;  %v459_v62 = vand.u32 2147483648, %v1233_v7  ;;  %vm439_vm9 = vweird.f32 %v1236_v10 }
  0xa5   :  { %872 = vtanh.f32 %v343_v0  ;;  %v328_v24 = vadd.f32 %v327_v16, %v150_v61  ;;  %v294_v26 = vpop.f32.mrf.mxu0  ;;  %v312_v28 = vpop.f32.mrf.mxu1  ;;  %v1253_v32 = vadd.f32 1.0, %v861_v21  ;;  %v435_v57 = vsub.f32 1.0, %v1263_v37 }
  0xa6   :  { %v1251_v31 = vpop.eup %862  ;;  %v295_v33 = vadd.f32 %v294_v26, %v1192_v59  ;;  %v313_v34 = vadd.f32 %v312_v28, %v1202_v18  ;;  %874 = vrcp.f32 %v1239_v11  ;;  %v1266_v39 = vpop.f32.mrf.mxu3  ;;  %v444_v59 = vand.u32 2147483648, %v1216_v41 }
  0xa7   :  { %v865_v36 = vpop.eup %864  ;;  %v828_v38 = vmul.f32 -1.442695, %v328_v24  ;;  %v170_v42 = vpop.permute.xlu1 %169  ;;  %876 = vrcp.f32 %v1248_v22  ;;  %v1280_v49 = vmul.f32 %v1251_v31, %v1224_v48  ;;  %vm1299_vm6 = vcmp.eq.f32.partialorder %v457_v44, 8.507059e+37 }
  0xa8   :  { %v867_v43 = vpop.eup %866  ;;  %v817_v18 = vmul.f32 -1.442695, %v295_v33  ;;  %878 = vrcp.f32 %v1253_v32  ;;  %v1283_v50 = vadd.f32 1.0, %v865_v36  ;;  %v165_v52 = vpop.permute.xlu0 %164  ;;  %v823_v55 = vmul.f32 -1.442695, %v313_v34 }
  0xa9   :  { %v1276_v47 = vpop.eup %868  ;;  %v1285_v51 = vadd.f32 1.0, %v867_v43  ;;  %880 = vpow2.f32 %v828_v38  ;;  %v340_v1 = vadd.f32 %v1209_v27, %v170_v42  ;;  %v525_v6 = vsub.f32 1.0, %v1280_v49 }
  0xaa   :  { %v871_v53 = vpop.eup %870  ;;  %v449_v54 = vmul.f32 %v1276_v47, %v1233_v7  ;;  %v624_v0 = vand.u32 2147483648, %v1248_v22  ;;  %v337_v27 = vadd.f32 %v1200_v13, %v165_v52  ;;  %vm454_vm7 = vweird.f32 %v1276_v47 }
  0xab   :  { %v1291_v56 = vpop.eup %872  ;;  %882 = vrcp.f32 %v1285_v51  ;;  %v1295_v61 = vadd.f32 1.0, %v871_v53  ;;  %vm468_vm10 = vweird.f32 %v1285_v51  ;;  %v472_v12 = vand.u32 2147483647, %v1285_v51  ;;  %vm1353_vm14 = vmor %vm453_vm4, %vm454_vm7 }
  0xac   :  { %v450_v63 = vsub.f32 1.0, %v449_v54  ;;  %884 = vpow2.f32 %v817_v18  ;;  %v330_v4 = vpop.f32.mrf.mxu2  ;;  %v1303_v5 = vpop.eup %874  ;;  %v426_v52 = vsel %vm1342_vm12, %v1214_v40, %v1258_v35  ;;  %vm1429_vm4 = vmor %vm438_vm13, %vm439_vm9  ;;  %v526_v41 = vmul.f32 %v1251_v31, %v525_v6 }
  0xad   :  { %886 = vrcp.f32 %v1283_v50  ;;  %v331_v8 = vadd.f32 %v330_v4, %v1228_v58  ;;  %v297_v9 = vpop.f32.mrf.mxu0  ;;  %v315_v15 = vpop.f32.mrf.mxu1  ;;  %v460_v58 = vor.u32 1.1754944e-38, %v459_v62  ;;  %vm1404_vm2 = vcmp.eq.f32.partialorder %v472_v12, 8.507059e+37 }
  0xae   :  { %v1309_v16 = vpop.eup %876  ;;  %888 = vpow2.f32 %v823_v55  ;;  %v451_v19 = vmul.f32 %v1276_v47, %v450_v63  ;;  %v298_v26 = vadd.f32 %v297_v9, %v1194_v60  ;;  %v316_v28 = vadd.f32 %v315_v15, %v1198_v2  ;;  %v348_v42 = vpop.f32.mrf.mxu3 }
  0xaf   :  { %v1320_v24 = vpop.eup %878  ;;  %890 = vrcp.f32 %v1295_v61  ;;  %v185_v13 = vpop.permute.xlu1 %184  ;;  %v474_v2 = vand.u32 2147483648, %v1285_v51  ;;  %v614_v55 = vmul.f32 %v1309_v16, %v1248_v22  ;;  %v431_v29 = vsel %vm1316_vm8, %v1243_v17, %v426_v52 }
  0xb0   :  { %v881_v33 = vpop.eup %880  ;;  %892 = vtanh.f32 %v340_v1  ;;  %v452_v34 = vadd.f32 %v1276_v47, %v451_v19  ;;  %v818_v43 = vmul.f32 -1.442695, %v298_v26  ;;  %v824_v18 = vmul.f32 -1.442695, %v316_v28  ;;  %v180_v40 = vpop.permute.xlu0 %179 }
  0xb1   :  { %v1335_v60 = vpop.eup %882  ;;  %894 = vtanh.f32 %v331_v8  ;;  %v349_v53 = vadd.f32 %v348_v42, %v185_v13  ;;  %v1378_v4 = vadd.f32 1.0, %v881_v33  ;;  %v436_v26 = vmul.f32 %v1236_v10, %v435_v57  ;;  %v190_v52 = vpop.permute.xlu2 %189 }
  0xb2   :  { %v885_v14 = vpop.eup %884  ;;  %v464_v44 = vmul.f32 %v1335_v60, %v1285_v51  ;;  %896 = vtanh.f32 %v337_v27  ;;  %v456_v7 = vsel %vm1353_vm14, %v1276_v47, %v452_v34  ;;  %v516_v47 = vsel %vm1374_vm15, %v1220_v45, %v1273_v46 }
  0xb3   :  { %v1361_v54 = vpop.eup %886  ;;  %v1365_v62 = vadd.f32 1.0, %v885_v14  ;;  %898 = vpow2.f32 %v818_v43  ;;  %vm469_vm0 = vweird.f32 %v1335_v60  ;;  %v461_v15 = vsel %vm1299_vm6, %v460_v58, %v456_v7 }
  0xb4   :  { %v889_v35 = vpop.eup %888  ;;  %v465_v1 = vsub.f32 1.0, %v464_v44  ;;  %900 = vpow2.f32 %v824_v18  ;;  %v333_v8 = vpop.f32.mrf.mxu2  ;;  %v346_v46 = vadd.f32 %v1266_v39, %v180_v40  ;;  %v615_v33 = vsub.f32 1.0, %v614_v55  ;;  %vm470_vm3 = vmor %vm468_vm10, %vm469_vm0 }
  0xb5   :  { %v1384_v9 = vpop.eup %890  ;;  %902 = vrcp.f32 %v1365_v62  ;;  %v1387_v25 = vadd.f32 1.0, %v889_v35  ;;  %v334_v58 = vadd.f32 %v333_v8, %v1212_v30  ;;  %v475_v37 = vor.u32 1.1754944e-38, %v474_v2 }
  0xb6   :  { %v893_v19 = vpop.eup %892  ;;  %v466_v45 = vmul.f32 %v1335_v60, %v465_v1  ;;  %904 = vtanh.f32 %v349_v53  ;;  %v437_v57 = vadd.f32 %v1236_v10, %v436_v26  ;;  %v521_v30 = vsel %vm1331_vm11, %v1246_v20, %v516_v47  ;;  %v351_v18 = vpop.f32.mrf.mxu3 }
  0xb7   :  { %v895_v28 = vpop.eup %894  ;;  %906 = vrcp.f32 %v1387_v25  ;;  %v445_v51 = vor.u32 1.1754944e-38, %v444_v59  ;;  %v1453_v53 = vmul.f32 %v1309_v16, %v615_v33  ;;  %v352_v49 = vadd.f32 %v351_v18, %v190_v52 }
  0xb8   :  { %v897_v13 = vpop.eup %896  ;;  %v467_v39 = vadd.f32 %v1335_v60, %v466_v45  ;;  %908 = vrcp.f32 %v1378_v4  ;;  %v666_v21 = vmul.f32 %v895_v28, %v431_v29  ;;  %vm529_vm5 = vweird.f32 %v1251_v31 }
  0xb9   :  { %v899_v34 = vpop.eup %898  ;;  %v668_v12 = vmul.f32 %v897_v13, %v461_v15  ;;  %910 = vtanh.f32 %v346_v46  ;;  %v527_v15 = vadd.f32 %v1251_v31, %v526_v41  ;;  %vm483_vm6 = vweird.f32 %v1365_v62 }
  0xba   :  { %v901_v17 = vpop.eup %900  ;;  %v471_v38 = vsel %vm470_vm3, %v1335_v60, %v467_v39  ;;  %v1423_v2 = vadd.f32 1.0, %v899_v34  ;;  %v441_v60 = vsel %vm1429_vm4, %v1236_v10, %v437_v57  ;;  %912 = vtanh.f32 %v334_v58 }
  0xbb   :  { %v1435_v43 = vpop.eup %902  ;;  %v476_v20 = vsel %vm1404_vm2, %v475_v37, %v471_v38  ;;  %v1439_v36 = vadd.f32 1.0, %v901_v17  ;;  %v489_v10 = vand.u32 2147483648, %v1365_v62  ;;  %v446_v63 = vsel %vm1394_vm1, %v445_v51, %v441_v60 }
  0xbc   :  { %v905_v14 = vpop.eup %904  ;;  %v479_v44 = vmul.f32 %v1435_v43, %v1365_v62  ;;  %v669_v23 = vmul.f32 %v893_v19, %v476_v20  ;;  %914 = vrcp.f32 %v1423_v2  ;;  %v502_v35 = vand.u32 2147483647, %v1423_v2 }
  0xbd   :  { %v1450_v59 = vpop.eup %906  ;;  %916 = vtanh.f32 %v668_v12  ;;  %v672_v55 = vmul.f32 %v905_v14, %v521_v30  ;;  %v504_v1 = vand.u32 2147483648, %v1423_v2  ;;  %vm498_vm7 = vweird.f32 %v1423_v2 }
  0xbe   :  { %v569_v7 = vmul.f32 %v1450_v59, %v1387_v25  ;;  %918 = vtanh.f32 %v666_v21  ;;  %v1460_v40 = vpop.eup %908  ;;  %v480_v6 = vsub.f32 1.0, %v479_v44  ;;  %v534_v19 = vand.u32 2147483648, %v1224_v48 }
  0xbf   :  { %920 = vrcp.f32 %v1439_v36  ;;  %v1465_v47 = vpop.eup %910  ;;  %v554_v45 = vmul.f32 %v1384_v9, %v1295_v61  ;;  %vm528_vm8 = vweird.f32 %v1224_v48  ;;  %v532_v28 = vand.u32 2147483647, %v1224_v48 }
  0xc0   :  { %v570_v8 = vsub.f32 1.0, %v569_v7  ;;  %922 = vtanh.f32 %v669_v23  ;;  %v913_v27 = vpop.eup %912  ;;  %v481_v29 = vmul.f32 %v1435_v43, %v480_v6  ;;  %v505_v13 = vor.u32 1.1754944e-38, %v504_v1  ;;  %vm1482_vm9 = vmor %vm528_vm8, %vm529_vm5 }
  0xc1   :  { %924 = vtanh.f32 %v672_v55  ;;  %v667_v26 = vmul.f32 %v913_v27, %v446_v63  ;;  %v555_v39 = vsub.f32 1.0, %v554_v45  ;;  %vm1489_vm10 = vcmp.eq.f32.partialorder %v502_v35, 8.507059e+37 }
  0xc2   :  { %v915_v46 = vpop.eup %914  ;;  %926 = vtanh.f32 %v352_v49  ;;  %v1487_v57 = vmul.f32 %v1450_v59, %v570_v8  ;;  %v531_v34 = vsel %vm1482_vm9, %v1251_v31, %v527_v15  ;;  %v562_v12 = vand.u32 2147483647, %v1295_v61 }
  0xc3   :  { %v1476_v3 = vpop.eup %916  ;;  %v494_v58 = vmul.f32 %v915_v46, %v1423_v2  ;;  %928 = vtanh.f32 %v667_v26  ;;  %v535_v17 = vor.u32 1.1754944e-38, %v534_v19  ;;  %v556_v38 = vmul.f32 %v1384_v9, %v555_v39 }
  0xc4   :  { %v919_v37 = vpop.eup %918  ;;  %vm559_vm11 = vweird.f32 %v1384_v9  ;;  %vm499_vm12 = vweird.f32 %v915_v46  ;;  %vm533_vm13 = vcmp.eq.f32.partialorder %v532_v28, 8.507059e+37  ;;  %v564_v51 = vand.u32 2147483648, %v1295_v61 }
  0xc5   :  { %v1497_v21 = vpop.eup %920  ;;  %v495_v30 = vsub.f32 1.0, %v494_v58  ;;  %v539_v20 = vmul.f32 %v1303_v5, %v1239_v11  ;;  %v536_v18 = vsel %vm533_vm13, %v535_v17, %v531_v34  ;;  %v557_v14 = vadd.f32 %v1384_v9, %v556_v38  ;;  %vm1523_vm2 = vmor %vm498_vm7, %vm499_vm12 }
  0xc6   :  { %v1501_v42 = vpop.eup %922  ;;  %vm558_vm14 = vweird.f32 %v1295_v61  ;;  %vm1514_vm0 = vcmp.eq.f32.partialorder %v562_v12, 8.507059e+37  ;;  %vm543_vm1 = vweird.f32 %v1239_v11  ;;  %v482_v55 = vadd.f32 %v1435_v43, %v481_v29 }
  0xc7   :  { %v1506_v31 = vpop.eup %924  ;;  %v496_v60 = vmul.f32 %v915_v46, %v495_v30  ;;  %vm1510_vm15 = vmor %vm558_vm14, %vm559_vm11  ;;  %v540_v52 = vsub.f32 1.0, %v539_v20  ;;  %v549_v49 = vand.u32 2147483648, %v1239_v11  ;;  %vm484_vm3 = vweird.f32 %v1435_v43 }
  0xc8   :  { %v927_v44 = vpop.eup %926  ;;  %v561_v63 = vsel %vm1510_vm15, %v1384_v9, %v557_v14  ;;  %v565_v35 = vor.u32 1.1754944e-38, %v564_v51  ;;  %vm544_vm4 = vweird.f32 %v1303_v5  ;;  %v547_v2 = vand.u32 2147483647, %v1239_v11  ;;  %vm1537_vm5 = vmor %vm483_vm6, %vm484_vm3  ;;  %v701_v51 = vpop.permute.xlu0 %700 }
  0xc9   :  { %v497_v7 = vadd.f32 %v915_v46, %v496_v60  ;;  %v929_v6 = vpop.eup %928  ;;  %v541_v1 = vmul.f32 %v1303_v5, %v540_v52  ;;  %v673_v15 = vmul.f32 %v927_v44, %v536_v18  ;;  %v486_v27 = vsel %vm1537_vm5, %v1435_v43, %v482_v55  ;;  %vm545_vm6 = vmor %vm543_vm1, %vm544_vm4 }
  0xca   :  { %v487_v19 = vand.u32 2147483647, %v1365_v62  ;;  %v566_v45 = vsel %vm1514_vm0, %v565_v35, %v561_v63  ;;  %v490_v28 = vor.u32 1.1754944e-38, %v489_v10  ;;  %v599_v29 = vmul.f32 %v1320_v24, %v1253_v32 }
  0xcb   :  { %v501_v9 = vsel %vm1523_vm2, %v915_v46, %v497_v7  ;;  %v542_v26 = vadd.f32 %v1303_v5, %v541_v1  ;;  %v683_v58 = vmul.f32 %v929_v6, %v566_v45  ;;  %v550_v43 = vor.u32 1.1754944e-38, %v549_v49  ;;  %v711_v6 = vpop.permute.xlu2 %710 }
  0xcc   :  { %v506_v46 = vsel %vm1489_vm10, %v505_v13, %v501_v9  ;;  %vm488_vm7 = vcmp.eq.f32.partialorder %v487_v19, 8.507059e+37  ;;  %vm548_vm8 = vcmp.eq.f32.partialorder %v547_v2, 8.507059e+37  ;;  %v600_v34 = vsub.f32 1.0, %v599_v29  ;;  %v706_v13 = vpop.permute.xlu1 %705 }
  0xcd   :  { %v546_v33 = vsel %vm545_vm6, %v1303_v5, %v542_v26  ;;  %v491_v39 = vsel %vm488_vm7, %v490_v28, %v486_v27  ;;  %vm573_vm9 = vweird.f32 %v1387_v25  ;;  %v579_v62 = vand.u32 2147483648, %v1387_v25 }
  0xce   :  { %930 = vtanh.f32 %v673_v15  ;;  %v551_v10 = vsel %vm548_vm8, %v550_v43, %v546_v33  ;;  %v671_v48 = vmul.f32 %v1465_v47, %v506_v46  ;;  %v601_v11 = vmul.f32 %v1320_v24, %v600_v34 }
  0xcf   :  { %v682_v12 = vmul.f32 %v919_v37, %v551_v10  ;;  %v670_v30 = vmul.f32 %v1291_v56, %v491_v39  ;;  %v739_v17 = vmul.f32 %v706_v13, %v683_v58  ;;  %v572_v5 = vadd.f32 %v1450_v59, %v1487_v57 }
  0xd0   :  { %vm574_vm10 = vweird.f32 %v1450_v59  ;;  %v577_v38 = vand.u32 2147483647, %v1387_v25  ;;  %vm618_vm11 = vweird.f32 %v1248_v22  ;;  %vm746_vm12 = vcmask 64512   ;;  %v716_v29 = vpop.permute.xlu0 %715 }
  0xd1   :  { %v602_v47 = vadd.f32 %v1320_v24, %v601_v11  ;;  %vm604_vm13 = vweird.f32 %v1320_v24  ;;  %932 = vtanh.f32 %v670_v30  ;;  %vm575_vm14 = vmor %vm573_vm9, %vm574_vm10  ;;  %v609_v56 = vand.u32 2147483648, %v1253_v32 }
  0xd2   :  { %v576_v37 = vsel %vm575_vm14, %v1450_v59, %v572_v5  ;;  %v580_v57 = vor.u32 1.1754944e-38, %v579_v62  ;;  %v584_v20 = vmul.f32 %v1497_v21, %v1439_v36  ;;  %v738_v60 = vmul.f32 %v701_v51, %v682_v12 }
  0xd3   :  { %vm603_vm15 = vweird.f32 %v1253_v32  ;;  %v607_v18 = vand.u32 2147483647, %v1253_v32  ;;  %vm578_vm0 = vcmp.eq.f32.partialorder %v577_v38, 8.507059e+37  ;;  %934 = vtanh.f32 %v671_v48  ;;  %v726_v38 = vpop.permute.xlu2 %725 }
  0xd4   :  { %v1579_v14 = vpop.eup %930  ;;  %v748_v25 = vsel %vm746_vm12, %v739_v17, 0.0  ;;  %vm1582_vm1 = vmor %vm603_vm15, %vm604_vm13  ;;  %v581_v59 = vsel %vm578_vm0, %v580_v57, %v576_v37  ;;  %v585_v23 = vsub.f32 1.0, %v584_v20  ;;  %v594_v52 = vand.u32 2147483648, %v1439_v36  ;;  %v721_v28 = vpop.permute.xlu1 %720 }
  0xd5   :  { %v606_v41 = vsel %vm1582_vm1, %v1320_v24, %v602_v47  ;;  %v684_v32 = vmul.f32 %v1476_v3, %v581_v59  ;;  %v644_v55 = vmul.f32 %v1460_v40, %v1378_v4  ;;  %v610_v7 = vor.u32 1.1754944e-38, %v609_v56 }
  0xd6   :  { %v586_v61 = vmul.f32 %v1497_v21, %v585_v23  ;;  %vm589_vm2 = vweird.f32 %v1497_v21  ;;  %v592_v63 = vand.u32 2147483647, %v1439_v36  ;;  %v747_v35 = vsel %vm746_vm12, %v738_v60, 0.0 }
  0xd7   :  { %v933_v49 = vpop.eup %932  ;;  %vm608_vm3 = vcmp.eq.f32.partialorder %v607_v18, 8.507059e+37  ;;  %vm588_vm4 = vweird.f32 %v1439_v36  ;;  %v645_v24 = vsub.f32 1.0, %v644_v55  ;;  %v749_v1 = vadd.f32 %v748_v25, %v747_v35 }
  0xd8   :  { %v611_v3 = vsel %vm608_vm3, %v610_v7, %v606_v41  ;;  %v587_v2 = vadd.f32 %v1497_v21, %v586_v61  ;;  %v595_v8 = vor.u32 1.1754944e-38, %v594_v52  ;;  %vm590_vm5 = vmor %vm588_vm4, %vm589_vm2  ;;  %v740_v9 = vmul.f32 %v711_v6, %v684_v32  ;;  %v731_v23 = vpop.permute.xlu0 %730 }
  0xd9   :  { %v646_v15 = vmul.f32 %v1460_v40, %v645_v24  ;;  %v617_v27 = vadd.f32 %v1309_v16, %v1453_v53  ;;  %vm619_vm6 = vweird.f32 %v1309_v16  ;;  %v935_v19 = vpop.eup %934  ;;  %v686_v45 = vmul.f32 %v933_v49, %v611_v3 }
  0xda   :  { %v591_v26 = vsel %vm590_vm5, %v1497_v21, %v587_v2  ;;  %vm593_vm7 = vcmp.eq.f32.partialorder %v592_v63, 8.507059e+37  ;;  %vm649_vm8 = vweird.f32 %v1460_v40  ;;  %vm1607_vm9 = vmor %vm618_vm11, %vm619_vm6  ;;  %v622_v21 = vand.u32 2147483647, %v1248_v22 }
  0xdb   :  { %v596_v46 = vsel %vm593_vm7, %v595_v8, %v591_v26  ;;  %v647_v53 = vadd.f32 %v1460_v40, %v646_v15  ;;  %v621_v58 = vsel %vm1607_vm9, %v1309_v16, %v617_v27  ;;  %vm648_vm10 = vweird.f32 %v1378_v4 }
  0xdc   :  { %v685_v43 = vmul.f32 %v1501_v42, %v596_v46  ;;  %v625_v33 = vor.u32 1.1754944e-38, %v624_v0  ;;  %v629_v39 = vmul.f32 %v1361_v54, %v1283_v50  ;;  %v750_v34 = vsel %vm746_vm12, %v740_v9, 0.0  ;;  %vm1627_vm13 = vmor %vm648_vm10, %vm649_vm8  ;;  %v736_v59 = vpop.permute.xlu1 %735 }
  0xdd   :  { %v652_v62 = vand.u32 2147483647, %v1378_v4  ;;  %v654_v10 = vand.u32 2147483648, %v1378_v4  ;;  %vm623_vm11 = vcmp.eq.f32.partialorder %v622_v21, 8.507059e+37  ;;  %v742_v16 = vmul.f32 %v721_v28, %v686_v45 }
  0xde   :  { %v741_v48 = vmul.f32 %v716_v29, %v685_v43  ;;  %v626_v22 = vsel %vm623_vm11, %v625_v33, %v621_v58  ;;  %v630_v0 = vsub.f32 1.0, %v629_v39  ;;  %v751_v13 = vadd.f32 %v750_v34, %v749_v1 }
  0xdf   :  { %v651_v12 = vsel %vm1627_vm13, %v1460_v40, %v647_v53  ;;  %v639_v11 = vand.u32 2147483648, %v1283_v50  ;;  %v687_v30 = vmul.f32 %v935_v19, %v626_v22  ;;  %vm634_vm14 = vweird.f32 %v1361_v54 }
  0xe0   :  { %v752_v4 = vsel %vm746_vm12, %v741_v48, 0.0  ;;  %v631_v17 = vmul.f32 %v1361_v54, %v630_v0  ;;  %v637_v5 = vand.u32 2147483647, %v1283_v50  ;;  %vm653_vm15 = vcmp.eq.f32.partialorder %v652_v62, 8.507059e+37 }
  0xe1   :  { %v753_v51 = vadd.f32 %v752_v4, %v751_v13  ;;  %v655_v47 = vor.u32 1.1754944e-38, %v654_v10  ;;  %v754_v56 = vsel %vm746_vm12, %v742_v16, 0.0  ;;  %vm633_vm0 = vweird.f32 %v1283_v50 }
  0xe2   :  { %v632_v37 = vadd.f32 %v1361_v54, %v631_v17  ;;  %v743_v40 = vmul.f32 %v726_v38, %v687_v30  ;;  %vm635_vm1 = vmor %vm633_vm0, %vm634_vm14  ;;  %v640_v20 = vor.u32 1.1754944e-38, %v639_v11  ;;  %vm638_vm2 = vcmp.eq.f32.partialorder %v637_v5, 8.507059e+37 }
  0xe3   :  { %v656_v57 = vsel %vm653_vm15, %v655_v47, %v651_v12  ;;  %v755_v44 = vadd.f32 %v754_v56, %v753_v51  ;;  %v769_v1 = vstv %s1658_s4  ;;  %vm771_vm3 = vcmask 57344  }
  0xe4   :  { %v689_v60 = vmul.f32 %v1579_v14, %v656_v57  ;;  %v636_v18 = vsel %vm635_vm1, %v1361_v54, %v632_v37  ;;  %v756_v25 = vsel %vm746_vm12, %v743_v40, 0.0 }
  0xe5   :  { %v641_v41 = vsel %vm638_vm2, %v640_v20, %v636_v18  ;;  %v757_v32 = vadd.f32 %v756_v25, %v755_v44 }
  0xe6   :  { %v688_v52 = vmul.f32 %v1506_v31, %v641_v41  ;;  %v745_v55 = vmul.f32 %v736_v59, %v689_v60 }
  0xe8   :  { %v744_v50 = vmul.f32 %v731_v23, %v688_v52  ;;  %v760_v63 = vsel %vm746_vm12, %v745_v55, 0.0 }
  0xea   :  { %v758_v7 = vsel %vm746_vm12, %v744_v50, 0.0 }
  0xeb   :  { %v759_v61 = vadd.f32 %v758_v7, %v757_v32 }
  0xed   :  { %v761_v14 = vadd.f32 %v760_v63, %v759_v61 }
  0xef   :  { %v762_v49 = vrot.slane %v761_v14, 4 }
  0xf1   :  { %v763_v54 = vadd.f32 %v762_v49, %v761_v14 }
  0xf3   :  { %v764_v6 = vrot.slane %v763_v54, 2 }
  0xf5   :  { %v765_v35 = vadd.f32 %v764_v6, %v763_v54 }
  0xf7   :  { %v766_v24 = vrot.slane %v765_v35, 1 }
  0xf9   :  { %v767_v31 = vadd.f32 %v766_v24, %v765_v35 }
  0xfb   :  { %v770_v3 = vadd.f32 %v769_v1, %v767_v31 }
  0xfd   :  { %772 = vst.msk [vmem:[#allocation3] sm:$0x1] %vm771_vm3, %v770_v3 }
  0xfe   :  { %783 = dma.vmem_to_hbm [thread:$0]  %s779_s30, 16, %s781_s8, [#allocation4]  }
  0xff   :  { %960 = dma.done.wait [#allocation4], 16  }
 0x100   :  { %961 = vsyncadd [#allocation4], 4294967280 }
 0x101   :  { %788 = vsyncpa [#allocation4], 1 }

</bundles_post_ra>
